<compile_context>
chip_gen: v6e
topology: v6e:2x2x1
jax: 0.10.0
libtpu: 0.0.40
codegen_flags: <defaults>
</compile_context>

<pallas_src>
import jax
import jax.numpy as jnp
from jax import lax
from jax.experimental import pallas as pl
from jax.experimental.pallas import tpu as pltpu

LN_EPS = 1e-5  # nn.LayerNorm default


def _silu(x):
    return x * (1.0 / (1.0 + jnp.exp(-x)))


def _softplus(x):
    return jnp.maximum(x, 0.0) + jnp.log1p(jnp.exp(-jnp.abs(x)))


# ----------------------------------------------------------------------------
# Pallas kernel: fused (add + LayerNorm) followed by the Mamba mixer, for one
# batch element per grid step.  Activations are (L, D) with D/E on lanes.
# ----------------------------------------------------------------------------
def _make_block_kernel(L, D, E, N, R, K, CH):
    f32 = jnp.float32
    bf16 = jnp.bfloat16
    n_chunks = L // CH

    def kernel(hs_ref, res_ref, ln_w_ref, ln_b_ref, w_in_ref, conv_w_ref,
               conv_b_ref, w_xproj_ref, w_dt_ref, b_dt_ref, a_log_ref, d_ref,
               w_out_ref, hid_out_ref, res_out_ref,
               conv_buf, dt_buf, u_buf, b_buf, c_buf, y_buf):
        # ---- fused residual add + LayerNorm (Block's own hot path) ----
        hs = hs_ref[...].astype(f32)          # (L, D)
        res = res_ref[...].astype(f32)        # (L, D)
        residual = res + hs
        mean = jnp.mean(residual, axis=-1, keepdims=True)
        var = jnp.mean(jnp.square(residual - mean), axis=-1, keepdims=True)
        xn = (residual - mean) * lax.rsqrt(var + LN_EPS)
        xn = xn * ln_w_ref[...] + ln_b_ref[...]
        res_out_ref[...] = residual           # residual_in_fp32=True

        # ---- fused in-projection: one bf16 MXU pass for [x | z] ----
        xz = jnp.dot(xn.astype(bf16), w_in_ref[...],
                     preferred_element_type=f32)              # (L, 2E)
        x_in = xz[:, :E]
        z = xz[:, E:]

        # ---- causal depthwise conv along L via VMEM staging buffer ----
        if K > 1:
            conv_buf[0:K - 1, :] = jnp.zeros((K - 1, E), f32)
        conv_buf[K - 1:K - 1 + L, :] = x_in
        conv_w = conv_w_ref[...]                              # (K, E)
        acc = jnp.zeros((L, E), f32)
        for k in range(K):
            acc = acc + conv_buf[k:k + L, :] * conv_w[k:k + 1, :]
        xc = _silu(acc + conv_b_ref[...])                     # (L, E)

        # ---- fused dt/B/C projection: one bf16 (E, R+2N) matmul ----
        xproj = jnp.dot(xc.astype(bf16), w_xproj_ref[...],
                        preferred_element_type=f32)           # (L, R+2N)
        xdt = xproj[:, :R]                                    # (L, R)
        Bm = xproj[:, R:R + N]                                # (L, N)
        Cm = xproj[:, R + N:R + 2 * N]                        # (L, N)
        dt = _softplus(jnp.dot(xdt, w_dt_ref[...],
                               preferred_element_type=f32) + b_dt_ref[...])  # (L, E)

        A = -jnp.exp(a_log_ref[...])                          # (N, E), f32

        # stage per-step quantities into VMEM so chunks can pl.ds-slice them
        dt_buf[...] = dt
        u_buf[...] = dt * xc
        b_buf[...] = Bm
        c_buf[...] = Cm
        y_buf[...] = xc * d_ref[...]                          # D-skip term

        # ---- selective scan: fori_loop over chunks of CH timesteps ----
        def chunk_body(c, h):
            s0 = pl.multiple_of(c * CH, CH)
            sl = pl.ds(s0, CH)
            dt_c = dt_buf[sl, :]                              # (CH, E)
            u_c = u_buf[sl, :]                                # (CH, E)
            B_c = b_buf[sl, :]                                # (CH, N)
            C_c = c_buf[sl, :]                                # (CH, N)
            # batched per-chunk precompute (one big exp instead of CH tiny ones)
            dA_c = jnp.exp(dt_c[:, None, :] * A[None, :, :])  # (CH, N, E)
            dBu_c = B_c[:, :, None] * u_c[:, None, :]         # (CH, N, E)
            h_steps = []
            for i in range(CH):                               # short, bounded unroll
                h = dA_c[i] * h + dBu_c[i]
                h_steps.append(h)
            H = jnp.stack(h_steps, axis=0)                    # (CH, N, E)
            y_c = jnp.sum(H * C_c[:, :, None], axis=1)        # (CH, E)
            y_buf[sl, :] = y_buf[sl, :] + y_c
            return h

        lax.fori_loop(0, n_chunks, chunk_body, jnp.zeros((N, E), f32))

        # ---- gate + out-projection (bf16 MXU, f32 accumulate) ----
        y = y_buf[...] * _silu(z)
        out = jnp.dot(y.astype(bf16), w_out_ref[...],
                      preferred_element_type=f32)             # (L, D)
        hid_out_ref[...] = out.astype(hid_out_ref.dtype)

    return kernel


def block_forward(hidden_states, residual, params):
    B, L, D = hidden_states.shape
    if residual is None:
        residual = jnp.zeros_like(hidden_states)

    E = params["win_x"].shape[1]
    N = params["a_log"].shape[0]
    R = params["wx_dt"].shape[1]
    K = params["conv_w"].shape[0]

    # chunk of timesteps per scan iteration (sublane group of 8 when possible)
    CH = 8
    while CH > 1 and L % CH != 0:
        CH //= 2

    f32 = jnp.float32
    bf16 = jnp.bfloat16
    # pack small projections into single MXU-friendly weights, cast to bf16
    w_in = jnp.concatenate([params["win_x"], params["win_z"]], axis=1).astype(bf16)     # (D, 2E)
    w_xproj = jnp.concatenate(
        [params["wx_dt"], params["wx_b"].T, params["wx_c"].T], axis=1).astype(bf16)     # (E, R+2N)
    w_out = params["w_out"].astype(bf16)                                                # (E, D)

    param_list = [params["ln_w"], params["ln_b"], w_in, params["conv_w"],
                  params["conv_b"], w_xproj, params["w_dt"].astype(f32),
                  params["b_dt"], params["a_log"], params["d"], w_out]

    io_spec = pl.BlockSpec((None, L, D), lambda b: (b, 0, 0))

    def param_spec(p):
        return pl.BlockSpec(p.shape, lambda b, _n=p.ndim: (0,) * _n)

    out_shape = (jax.ShapeDtypeStruct((B, L, D), hidden_states.dtype),  # model dtype
                 jax.ShapeDtypeStruct((B, L, D), jnp.float32))          # residual f32

    scratch = [
        pltpu.VMEM((L + K - 1, E), f32),   # conv staging (K-1 zero head rows)
        pltpu.VMEM((L, E), f32),           # dt
        pltpu.VMEM((L, E), f32),           # dt * xc
        pltpu.VMEM((L, N), f32),           # B
        pltpu.VMEM((L, N), f32),           # C
        pltpu.VMEM((L, E), f32),           # y accumulator (init = d * xc)
    ]

    fn = pl.pallas_call(
        _make_block_kernel(L, D, E, N, R, K, CH),
        out_shape=out_shape,
        grid=(B,),
        in_specs=[io_spec, io_spec] + [param_spec(p) for p in param_list],
        out_specs=(io_spec, io_spec),
        scratch_shapes=scratch,
        compiler_params=pltpu.CompilerParams(
            dimension_semantics=("parallel",),          # batch is independent (v7x 2 TC)
            vmem_limit_bytes=64 * 1024 * 1024),
    )
    return fn(hidden_states, residual, *param_list)


# ----------------------------------------------------------------------------
# Pure-JAX reference (independent formulation) for correctness check.
# ----------------------------------------------------------------------------
def block_reference(hs, res, p):
    if res is None:
        res = jnp.zeros_like(hs)
    hp = lax.Precision.HIGHEST
    residual = res.astype(jnp.float32) + hs.astype(jnp.float32)
    mean = residual.mean(-1, keepdims=True)
    var = jnp.square(residual - mean).mean(-1, keepdims=True)
    xn = (residual - mean) * lax.rsqrt(var + LN_EPS) * p["ln_w"][0] + p["ln_b"][0]

    x_in = jnp.einsum("bld,de->ble", xn, p["win_x"], precision=hp)
    z = jnp.einsum("bld,de->ble", xn, p["win_z"], precision=hp)
    Bsz, L, E = x_in.shape
    K = p["conv_w"].shape[0]
    xpad = jnp.pad(x_in, ((0, 0), (K - 1, 0), (0, 0)))
    acc = jnp.zeros_like(x_in)
    for k in range(K):
        acc = acc + xpad[:, k:k + L, :] * p["conv_w"][k]
    xc = _silu(acc + p["conv_b"][0])

    xdt = jnp.einsum("ble,er->blr", xc, p["wx_dt"], precision=hp)
    dt = _softplus(jnp.einsum("blr,re->ble", xdt, p["w_dt"], precision=hp) + p["b_dt"][0])
    Bm = jnp.einsum("ble,ne->bln", xc, p["wx_b"], precision=hp)
    Cm = jnp.einsum("ble,ne->bln", xc, p["wx_c"], precision=hp)
    A_en = -jnp.exp(p["a_log"]).T                      # (E, N)
    N = A_en.shape[1]

    h = jnp.zeros((Bsz, E, N), jnp.float32)
    ys = []
    for l in range(L):
        dA = jnp.exp(dt[:, l, :, None] * A_en[None])                            # (B,E,N)
        dBu = dt[:, l, :, None] * Bm[:, l, None, :] * xc[:, l, :, None]          # (B,E,N)
        h = dA * h + dBu
        ys.append(jnp.einsum("ben,bn->be", h, Cm[:, l], precision=hp)
                  + p["d"][0] * xc[:, l])
    y = jnp.stack(ys, axis=1)                          # (B,L,E)
    y = y * _silu(z)
    out = jnp.einsum("ble,ed->bld", y, p["w_out"], precision=hp)
    return out, residual


def init_params(key, D, E, N, R, K):
    ks = jax.random.split(key, 9)
    f32 = jnp.float32
    params = {
        "ln_w": jnp.ones((1, D), f32),                      # nn.LayerNorm init
        "ln_b": jnp.zeros((1, D), f32),
        "win_x": 0.05 * jax.random.normal(ks[0], (D, E), f32),
        "win_z": 0.05 * jax.random.normal(ks[1], (D, E), f32),
        "conv_w": 0.20 * jax.random.normal(ks[2], (K, E), f32),
        "conv_b": 0.05 * jax.random.normal(ks[3], (1, E), f32),
        "wx_dt": 0.10 * jax.random.normal(ks[4], (E, R), f32),
        "wx_b": 0.10 * jax.random.normal(ks[5], (N, E), f32),
        "wx_c": 0.10 * jax.random.normal(ks[6], (N, E), f32),
        "w_dt": 0.20 * jax.random.normal(ks[7], (R, E), f32),
        "b_dt": jnp.log(jnp.expm1(jnp.full((1, E), 0.05, f32))),   # softplus^-1(0.05)
        "a_log": jnp.broadcast_to(
            jnp.log(jnp.arange(1.0, N + 1.0, dtype=f32))[:, None], (N, E)).astype(f32),
        "d": jnp.ones((1, E), f32),
        "w_out": 0.05 * jax.random.normal(ks[8], (E, D), f32),
    }
    return params


if __name__ == "__main__":
    B, L, D = 2, 8, 32        # batch, seq, model dim
    E, N, R, K = 64, 8, 4, 4  # d_inner=2*D, d_state, dt_rank, d_conv

    key = jax.random.PRNGKey(0)
    k_h, k_r, k_p = jax.random.split(key, 3)
    hidden_states = jax.random.normal(k_h, (B, L, D), jnp.float32)
    residual_in = jax.random.normal(k_r, (B, L, D), jnp.float32)
    params = init_params(k_p, D, E, N, R, K)

    hid, resid = block_forward(hidden_states, residual_in, params)
    jax.block_until_ready((hid, resid))

    ref_hid, ref_res = block_reference(hidden_states, residual_in, params)
    # kernel uses bf16 MXU operands (f32 accumulate) -> slightly looser tolerance
    ok_h = bool(jnp.allclose(hid.astype(jnp.float32), ref_hid, atol=2e-2, rtol=2e-2))
    ok_r = bool(jnp.allclose(resid, ref_res, atol=1e-5, rtol=1e-5))
    if not (ok_h and ok_r):
        raise AssertionError(
            f"mismatch: hidden max|Δ|={float(jnp.max(jnp.abs(hid - ref_hid)))}, "
            f"residual max|Δ|={float(jnp.max(jnp.abs(resid - ref_res)))}")
    print("KERNEL_OK")
</pallas_src>

<mosaic_0001>
module attributes {stable_mosaic.version = 11 : i64} {
  func.func @kernel(%arg0: i32, %arg1: memref<1x8x32xf32, #tpu.memory_space<vmem>>, %arg2: memref<1x8x32xf32, #tpu.memory_space<vmem>>, %arg3: memref<1x32xf32, #tpu.memory_space<vmem>>, %arg4: memref<1x32xf32, #tpu.memory_space<vmem>>, %arg5: memref<32x128xbf16, #tpu.memory_space<vmem>>, %arg6: memref<4x64xf32, #tpu.memory_space<vmem>>, %arg7: memref<1x64xf32, #tpu.memory_space<vmem>>, %arg8: memref<64x20xbf16, #tpu.memory_space<vmem>>, %arg9: memref<4x64xf32, #tpu.memory_space<vmem>>, %arg10: memref<1x64xf32, #tpu.memory_space<vmem>>, %arg11: memref<8x64xf32, #tpu.memory_space<vmem>>, %arg12: memref<1x64xf32, #tpu.memory_space<vmem>>, %arg13: memref<64x32xbf16, #tpu.memory_space<vmem>>, %arg14: memref<1x8x32xf32, #tpu.memory_space<vmem>>, %arg15: memref<1x8x32xf32, #tpu.memory_space<vmem>>, %arg16: memref<11x64xf32, #tpu.memory_space<vmem>>, %arg17: memref<8x64xf32, #tpu.memory_space<vmem>>, %arg18: memref<8x64xf32, #tpu.memory_space<vmem>>, %arg19: memref<8x8xf32, #tpu.memory_space<vmem>>, %arg20: memref<8x8xf32, #tpu.memory_space<vmem>>, %arg21: memref<8x64xf32, #tpu.memory_space<vmem>>) attributes {dimension_semantics = [#tpu.dimension_semantics<parallel>], iteration_bounds = array<i64: 2>, scalar_prefetch = 0 : i64, scratch_operands = 6 : i64, tpu.core_type = #tpu.core_type<tc>, window_params = [{transform_indices = @transform_0, window_bounds = array<i64: 1, 8, 32>}, {transform_indices = @transform_1, window_bounds = array<i64: 1, 8, 32>}, {pipeline_mode = #tpu.pipeline_mode<synchronous>, transform_indices = @transform_2, window_bounds = array<i64: 1, 32>}, {pipeline_mode = #tpu.pipeline_mode<synchronous>, transform_indices = @transform_3, window_bounds = array<i64: 1, 32>}, {pipeline_mode = #tpu.pipeline_mode<synchronous>, transform_indices = @transform_4, window_bounds = array<i64: 32, 128>}, {pipeline_mode = #tpu.pipeline_mode<synchronous>, transform_indices = @transform_5, window_bounds = array<i64: 4, 64>}, {pipeline_mode = #tpu.pipeline_mode<synchronous>, transform_indices = @transform_6, window_bounds = array<i64: 1, 64>}, {pipeline_mode = #tpu.pipeline_mode<synchronous>, transform_indices = @transform_7, window_bounds = array<i64: 64, 20>}, {pipeline_mode = #tpu.pipeline_mode<synchronous>, transform_indices = @transform_8, window_bounds = array<i64: 4, 64>}, {pipeline_mode = #tpu.pipeline_mode<synchronous>, transform_indices = @transform_9, window_bounds = array<i64: 1, 64>}, {pipeline_mode = #tpu.pipeline_mode<synchronous>, transform_indices = @transform_10, window_bounds = array<i64: 8, 64>}, {pipeline_mode = #tpu.pipeline_mode<synchronous>, transform_indices = @transform_11, window_bounds = array<i64: 1, 64>}, {pipeline_mode = #tpu.pipeline_mode<synchronous>, transform_indices = @transform_12, window_bounds = array<i64: 64, 32>}, {transform_indices = @transform_13, window_bounds = array<i64: 1, 8, 32>}, {transform_indices = @transform_14, window_bounds = array<i64: 1, 8, 32>}]} {
    %c0 = arith.constant 0 : index
    %c0_0 = arith.constant 0 : index
    %c0_1 = arith.constant 0 : index
    %0 = vector.load %arg1[%c0, %c0_0, %c0_1] : memref<1x8x32xf32, #tpu.memory_space<vmem>>, vector<1x8x32xf32>
    %1 = vector.shape_cast %0 : vector<1x8x32xf32> to vector<8x32xf32>
    %c0_2 = arith.constant 0 : index
    %c0_3 = arith.constant 0 : index
    %c0_4 = arith.constant 0 : index
    %2 = vector.load %arg2[%c0_2, %c0_3, %c0_4] : memref<1x8x32xf32, #tpu.memory_space<vmem>>, vector<1x8x32xf32>
    %3 = vector.shape_cast %2 : vector<1x8x32xf32> to vector<8x32xf32>
    %4 = arith.addf %3, %1 : vector<8x32xf32>
    %cst = arith.constant dense<0.000000e+00> : vector<8xf32>
    %5 = vector.multi_reduction <add>, %4, %cst [1] : vector<8x32xf32> to vector<8xf32>
    %6 = vector.shape_cast %5 : vector<8xf32> to vector<8x1xf32>
    %cst_5 = arith.constant 3.200000e+01 : f32
    %7 = vector.broadcast %cst_5 : f32 to vector<8x1xf32>
    %8 = arith.divf %6, %7 : vector<8x1xf32>
    %9 = vector.broadcast %8 : vector<8x1xf32> to vector<8x32xf32>
    %10 = arith.subf %4, %9 : vector<8x32xf32>
    %11 = arith.mulf %10, %10 : vector<8x32xf32>
    %cst_6 = arith.constant dense<0.000000e+00> : vector<8xf32>
    %12 = vector.multi_reduction <add>, %11, %cst_6 [1] : vector<8x32xf32> to vector<8xf32>
    %13 = vector.shape_cast %12 : vector<8xf32> to vector<8x1xf32>
    %cst_7 = arith.constant 3.200000e+01 : f32
    %14 = vector.broadcast %cst_7 : f32 to vector<8x1xf32>
    %15 = arith.divf %13, %14 : vector<8x1xf32>
    %16 = vector.broadcast %8 : vector<8x1xf32> to vector<8x32xf32>
    %17 = arith.subf %4, %16 : vector<8x32xf32>
    %cst_8 = arith.constant 9.99999974E-6 : f32
    %18 = vector.broadcast %cst_8 : f32 to vector<8x1xf32>
    %19 = arith.addf %15, %18 : vector<8x1xf32>
    %20 = math.rsqrt %19 : vector<8x1xf32>
    %21 = vector.broadcast %20 : vector<8x1xf32> to vector<8x32xf32>
    %22 = arith.mulf %17, %21 : vector<8x32xf32>
    %c0_9 = arith.constant 0 : index
    %c0_10 = arith.constant 0 : index
    %23 = vector.load %arg3[%c0_9, %c0_10] : memref<1x32xf32, #tpu.memory_space<vmem>>, vector<1x32xf32>
    %24 = vector.broadcast %23 : vector<1x32xf32> to vector<8x32xf32>
    %25 = arith.mulf %22, %24 : vector<8x32xf32>
    %c0_11 = arith.constant 0 : index
    %c0_12 = arith.constant 0 : index
    %26 = vector.load %arg4[%c0_11, %c0_12] : memref<1x32xf32, #tpu.memory_space<vmem>>, vector<1x32xf32>
    %27 = vector.broadcast %26 : vector<1x32xf32> to vector<8x32xf32>
    %28 = arith.addf %25, %27 : vector<8x32xf32>
    %c0_13 = arith.constant 0 : index
    %c0_14 = arith.constant 0 : index
    %c0_15 = arith.constant 0 : index
    %29 = vector.load %arg15[%c0_13, %c0_14, %c0_15] : memref<1x8x32xf32, #tpu.memory_space<vmem>>, vector<1x8x32xf32>
    %30 = vector.shape_cast %29 : vector<1x8x32xf32> to vector<8x32xf32>
    %31 = vector.shape_cast %4 : vector<8x32xf32> to vector<1x8x32xf32>
    tpu.vector_store %arg15[%c0_13, %c0_14, %c0_15], %31 {strides = array<i32>} : memref<1x8x32xf32, #tpu.memory_space<vmem>>, vector<1x8x32xf32>,
    %32 = arith.truncf %28 : vector<8x32xf32> to vector<8x32xbf16>
    %c0_16 = arith.constant 0 : index
    %c0_17 = arith.constant 0 : index
    %33 = vector.load %arg5[%c0_16, %c0_17] : memref<32x128xbf16, #tpu.memory_space<vmem>>, vector<32x128xbf16>
    %cst_18 = arith.constant dense<0.000000e+00> : vector<8x128xf32>
    %34 = tpu.matmul %32, %33, %cst_18 {dimension_numbers = #tpu.dot_dimension_numbers<[1], [0], [0], [1], [0, 0, 1, 1], [], []>} : vector<8x32xbf16>, vector<32x128xbf16>, vector<8x128xf32> -> vector<8x128xf32>
    %35 = vector.extract_strided_slice %34 {offsets = [0, 0], sizes = [8, 64], strides = [1, 1]} : vector<8x128xf32> to vector<8x64xf32>
    %36 = vector.extract_strided_slice %34 {offsets = [0, 64], sizes = [8, 64], strides = [1, 1]} : vector<8x128xf32> to vector<8x64xf32>
    %cst_19 = arith.constant 0.000000e+00 : f32
    %37 = vector.broadcast %cst_19 : f32 to vector<3x64xf32>
    %c0_20 = arith.constant 0 : index
    %c0_21 = arith.constant 0 : index
    %38 = vector.load %arg16[%c0_20, %c0_21] : memref<11x64xf32, #tpu.memory_space<vmem>>, vector<3x64xf32>
    tpu.vector_store %arg16[%c0_20, %c0_21], %37 {strides = array<i32>} : memref<11x64xf32, #tpu.memory_space<vmem>>, vector<3x64xf32>,
    %c3 = arith.constant 3 : index
    %c0_22 = arith.constant 0 : index
    %39 = vector.load %arg16[%c3, %c0_22] : memref<11x64xf32, #tpu.memory_space<vmem>>, vector<8x64xf32>
    tpu.vector_store %arg16[%c3, %c0_22], %35 {strides = array<i32>} : memref<11x64xf32, #tpu.memory_space<vmem>>, vector<8x64xf32>,
    %c0_23 = arith.constant 0 : index
    %c0_24 = arith.constant 0 : index
    %40 = vector.load %arg6[%c0_23, %c0_24] : memref<4x64xf32, #tpu.memory_space<vmem>>, vector<4x64xf32>
    %cst_25 = arith.constant 0.000000e+00 : f32
    %41 = vector.broadcast %cst_25 : f32 to vector<8x64xf32>
    %c0_26 = arith.constant 0 : index
    %c0_27 = arith.constant 0 : index
    %42 = vector.load %arg16[%c0_26, %c0_27] : memref<11x64xf32, #tpu.memory_space<vmem>>, vector<8x64xf32>
    %43 = vector.extract_strided_slice %40 {offsets = [0, 0], sizes = [1, 64], strides = [1, 1]} : vector<4x64xf32> to vector<1x64xf32>
    %44 = vector.broadcast %43 : vector<1x64xf32> to vector<8x64xf32>
    %45 = arith.mulf %42, %44 : vector<8x64xf32>
    %46 = arith.addf %41, %45 : vector<8x64xf32>
    %c1 = arith.constant 1 : index
    %c0_28 = arith.constant 0 : index
    %47 = vector.load %arg16[%c1, %c0_28] : memref<11x64xf32, #tpu.memory_space<vmem>>, vector<8x64xf32>
    %48 = vector.extract_strided_slice %40 {offsets = [1, 0], sizes = [1, 64], strides = [1, 1]} : vector<4x64xf32> to vector<1x64xf32>
    %49 = vector.broadcast %48 : vector<1x64xf32> to vector<8x64xf32>
    %50 = arith.mulf %47, %49 : vector<8x64xf32>
    %51 = arith.addf %46, %50 : vector<8x64xf32>
    %c2 = arith.constant 2 : index
    %c0_29 = arith.constant 0 : index
    %52 = vector.load %arg16[%c2, %c0_29] : memref<11x64xf32, #tpu.memory_space<vmem>>, vector<8x64xf32>
    %53 = vector.extract_strided_slice %40 {offsets = [2, 0], sizes = [1, 64], strides = [1, 1]} : vector<4x64xf32> to vector<1x64xf32>
    %54 = vector.broadcast %53 : vector<1x64xf32> to vector<8x64xf32>
    %55 = arith.mulf %52, %54 : vector<8x64xf32>
    %56 = arith.addf %51, %55 : vector<8x64xf32>
    %c3_30 = arith.constant 3 : index
    %c0_31 = arith.constant 0 : index
    %57 = vector.load %arg16[%c3_30, %c0_31] : memref<11x64xf32, #tpu.memory_space<vmem>>, vector<8x64xf32>
    %58 = vector.extract_strided_slice %40 {offsets = [3, 0], sizes = [1, 64], strides = [1, 1]} : vector<4x64xf32> to vector<1x64xf32>
    %59 = vector.broadcast %58 : vector<1x64xf32> to vector<8x64xf32>
    %60 = arith.mulf %57, %59 : vector<8x64xf32>
    %61 = arith.addf %56, %60 : vector<8x64xf32>
    %c0_32 = arith.constant 0 : index
    %c0_33 = arith.constant 0 : index
    %62 = vector.load %arg7[%c0_32, %c0_33] : memref<1x64xf32, #tpu.memory_space<vmem>>, vector<1x64xf32>
    %63 = vector.broadcast %62 : vector<1x64xf32> to vector<8x64xf32>
    %64 = arith.addf %61, %63 : vector<8x64xf32>
    %cst_34 = arith.constant 0.000000e+00 : f32
    %65 = vector.broadcast %cst_34 : f32 to vector<8x64xf32>
    %66 = arith.subf %65, %64 : vector<8x64xf32>
    %67 = math.exp %66 : vector<8x64xf32>
    %cst_35 = arith.constant 1.000000e+00 : f32
    %68 = vector.broadcast %cst_35 : f32 to vector<8x64xf32>
    %69 = arith.addf %68, %67 : vector<8x64xf32>
    %cst_36 = arith.constant 1.000000e+00 : f32
    %70 = vector.broadcast %cst_36 : f32 to vector<8x64xf32>
    %71 = arith.divf %70, %69 : vector<8x64xf32>
    %72 = arith.mulf %64, %71 : vector<8x64xf32>
    %73 = arith.truncf %72 : vector<8x64xf32> to vector<8x64xbf16>
    %c0_37 = arith.constant 0 : index
    %c0_38 = arith.constant 0 : index
    %74 = vector.load %arg8[%c0_37, %c0_38] : memref<64x20xbf16, #tpu.memory_space<vmem>>, vector<64x20xbf16>
    %cst_39 = arith.constant dense<0.000000e+00> : vector<8x20xf32>
    %75 = tpu.matmul %73, %74, %cst_39 {dimension_numbers = #tpu.dot_dimension_numbers<[1], [0], [0], [1], [0, 0, 1, 1], [], []>} : vector<8x64xbf16>, vector<64x20xbf16>, vector<8x20xf32> -> vector<8x20xf32>
    %76 = vector.extract_strided_slice %75 {offsets = [0, 0], sizes = [8, 4], strides = [1, 1]} : vector<8x20xf32> to vector<8x4xf32>
    %77 = vector.extract_strided_slice %75 {offsets = [0, 4], sizes = [8, 8], strides = [1, 1]} : vector<8x20xf32> to vector<8x8xf32>
    %78 = vector.extract_strided_slice %75 {offsets = [0, 12], sizes = [8, 8], strides = [1, 1]} : vector<8x20xf32> to vector<8x8xf32>
    %c0_40 = arith.constant 0 : index
    %c0_41 = arith.constant 0 : index
    %79 = vector.load %arg9[%c0_40, %c0_41] : memref<4x64xf32, #tpu.memory_space<vmem>>, vector<4x64xf32>
    %cst_42 = arith.constant dense<0.000000e+00> : vector<8x64xf32>
    %80 = tpu.matmul %76, %79, %cst_42 {dimension_numbers = #tpu.dot_dimension_numbers<[1], [0], [0], [1], [0, 0, 1, 1], [], []>} : vector<8x4xf32>, vector<4x64xf32>, vector<8x64xf32> -> vector<8x64xf32>
    %c0_43 = arith.constant 0 : index
    %c0_44 = arith.constant 0 : index
    %81 = vector.load %arg10[%c0_43, %c0_44] : memref<1x64xf32, #tpu.memory_space<vmem>>, vector<1x64xf32>
    %82 = vector.broadcast %81 : vector<1x64xf32> to vector<8x64xf32>
    %83 = arith.addf %80, %82 : vector<8x64xf32>
    %cst_45 = arith.constant 0.000000e+00 : f32
    %84 = vector.broadcast %cst_45 : f32 to vector<8x64xf32>
    %85 = arith.maximumf %83, %84 : vector<8x64xf32>
    %86 = math.absf %83 : vector<8x64xf32>
    %cst_46 = arith.constant 0.000000e+00 : f32
    %87 = vector.broadcast %cst_46 : f32 to vector<8x64xf32>
    %88 = arith.subf %87, %86 : vector<8x64xf32>
    %89 = math.exp %88 : vector<8x64xf32>
    %90 = math.log1p %89 : vector<8x64xf32>
    %91 = arith.addf %85, %90 : vector<8x64xf32>
    %c0_47 = arith.constant 0 : index
    %c0_48 = arith.constant 0 : index
    %92 = vector.load %arg11[%c0_47, %c0_48] : memref<8x64xf32, #tpu.memory_space<vmem>>, vector<8x64xf32>
    %93 = math.exp %92 : vector<8x64xf32>
    %cst_49 = arith.constant 0.000000e+00 : f32
    %94 = vector.broadcast %cst_49 : f32 to vector<8x64xf32>
    %95 = arith.subf %94, %93 : vector<8x64xf32>
    %c0_50 = arith.constant 0 : index
    %c0_51 = arith.constant 0 : index
    %96 = vector.load %arg17[%c0_50, %c0_51] : memref<8x64xf32, #tpu.memory_space<vmem>>, vector<8x64xf32>
    tpu.vector_store %arg17[%c0_50, %c0_51], %91 {strides = array<i32>} : memref<8x64xf32, #tpu.memory_space<vmem>>, vector<8x64xf32>,
    %97 = arith.mulf %91, %72 : vector<8x64xf32>
    %c0_52 = arith.constant 0 : index
    %c0_53 = arith.constant 0 : index
    %98 = vector.load %arg18[%c0_52, %c0_53] : memref<8x64xf32, #tpu.memory_space<vmem>>, vector<8x64xf32>
    tpu.vector_store %arg18[%c0_52, %c0_53], %97 {strides = array<i32>} : memref<8x64xf32, #tpu.memory_space<vmem>>, vector<8x64xf32>,
    %c0_54 = arith.constant 0 : index
    %c0_55 = arith.constant 0 : index
    %99 = vector.load %arg19[%c0_54, %c0_55] : memref<8x8xf32, #tpu.memory_space<vmem>>, vector<8x8xf32>
    tpu.vector_store %arg19[%c0_54, %c0_55], %77 {strides = array<i32>} : memref<8x8xf32, #tpu.memory_space<vmem>>, vector<8x8xf32>,
    %c0_56 = arith.constant 0 : index
    %c0_57 = arith.constant 0 : index
    %100 = vector.load %arg20[%c0_56, %c0_57] : memref<8x8xf32, #tpu.memory_space<vmem>>, vector<8x8xf32>
    tpu.vector_store %arg20[%c0_56, %c0_57], %78 {strides = array<i32>} : memref<8x8xf32, #tpu.memory_space<vmem>>, vector<8x8xf32>,
    %c0_58 = arith.constant 0 : index
    %c0_59 = arith.constant 0 : index
    %101 = vector.load %arg12[%c0_58, %c0_59] : memref<1x64xf32, #tpu.memory_space<vmem>>, vector<1x64xf32>
    %102 = vector.broadcast %101 : vector<1x64xf32> to vector<8x64xf32>
    %103 = arith.mulf %72, %102 : vector<8x64xf32>
    %c0_60 = arith.constant 0 : index
    %c0_61 = arith.constant 0 : index
    %104 = vector.load %arg21[%c0_60, %c0_61] : memref<8x64xf32, #tpu.memory_space<vmem>>, vector<8x64xf32>
    tpu.vector_store %arg21[%c0_60, %c0_61], %103 {strides = array<i32>} : memref<8x64xf32, #tpu.memory_space<vmem>>, vector<8x64xf32>,
    %cst_62 = arith.constant 0.000000e+00 : f32
    %105 = vector.broadcast %cst_62 : f32 to vector<8x64xf32>
    %c0_i32 = arith.constant 0 : i32
    %c8_i32 = arith.constant 8 : i32
    %106 = arith.muli %c0_i32, %c8_i32 : i32
    %107 = tpu.assume_multiple %106, 8 : i32
    %108 = arith.index_cast %107 : i32 to index
    %c0_63 = arith.constant 0 : index
    %109 = vector.load %arg17[%108, %c0_63] : memref<8x64xf32, #tpu.memory_space<vmem>>, vector<8x64xf32>
    %110 = arith.index_cast %107 : i32 to index
    %c0_64 = arith.constant 0 : index
    %111 = vector.load %arg18[%110, %c0_64] : memref<8x64xf32, #tpu.memory_space<vmem>>, vector<8x64xf32>
    %112 = arith.index_cast %107 : i32 to index
    %c0_65 = arith.constant 0 : index
    %113 = vector.load %arg19[%112, %c0_65] : memref<8x8xf32, #tpu.memory_space<vmem>>, vector<8x8xf32>
    %114 = arith.index_cast %107 : i32 to index
    %c0_66 = arith.constant 0 : index
    %115 = vector.load %arg20[%114, %c0_66] : memref<8x8xf32, #tpu.memory_space<vmem>>, vector<8x8xf32>
    %116 = vector.shape_cast %109 : vector<8x64xf32> to vector<8x1x64xf32>
    %117 = vector.shape_cast %95 : vector<8x64xf32> to vector<1x8x64xf32>
    %118 = vector.broadcast %116 : vector<8x1x64xf32> to vector<8x8x64xf32>
    %119 = vector.broadcast %117 : vector<1x8x64xf32> to vector<8x8x64xf32>
    %120 = arith.mulf %118, %119 : vector<8x8x64xf32>
    %121 = math.exp %120 : vector<8x8x64xf32>
    %122 = vector.shape_cast %113 : vector<8x8xf32> to vector<8x8x1xf32>
    %123 = vector.shape_cast %111 : vector<8x64xf32> to vector<8x1x64xf32>
    %124 = vector.broadcast %122 : vector<8x8x1xf32> to vector<8x8x64xf32>
    %125 = vector.broadcast %123 : vector<8x1x64xf32> to vector<8x8x64xf32>
    %126 = arith.mulf %124, %125 : vector<8x8x64xf32>
    %127 = vector.extract_strided_slice %121 {offsets = [0, 0, 0], sizes = [1, 8, 64], strides = [1, 1, 1]} : vector<8x8x64xf32> to vector<1x8x64xf32>
    %128 = vector.shape_cast %127 : vector<1x8x64xf32> to vector<8x64xf32>
    %129 = arith.mulf %128, %105 : vector<8x64xf32>
    %130 = vector.extract_strided_slice %126 {offsets = [0, 0, 0], sizes = [1, 8, 64], strides = [1, 1, 1]} : vector<8x8x64xf32> to vector<1x8x64xf32>
    %131 = vector.shape_cast %130 : vector<1x8x64xf32> to vector<8x64xf32>
    %132 = arith.addf %129, %131 : vector<8x64xf32>
    %133 = vector.extract_strided_slice %121 {offsets = [1, 0, 0], sizes = [1, 8, 64], strides = [1, 1, 1]} : vector<8x8x64xf32> to vector<1x8x64xf32>
    %134 = vector.shape_cast %133 : vector<1x8x64xf32> to vector<8x64xf32>
    %135 = arith.mulf %134, %132 : vector<8x64xf32>
    %136 = vector.extract_strided_slice %126 {offsets = [1, 0, 0], sizes = [1, 8, 64], strides = [1, 1, 1]} : vector<8x8x64xf32> to vector<1x8x64xf32>
    %137 = vector.shape_cast %136 : vector<1x8x64xf32> to vector<8x64xf32>
    %138 = arith.addf %135, %137 : vector<8x64xf32>
    %139 = vector.extract_strided_slice %121 {offsets = [2, 0, 0], sizes = [1, 8, 64], strides = [1, 1, 1]} : vector<8x8x64xf32> to vector<1x8x64xf32>
    %140 = vector.shape_cast %139 : vector<1x8x64xf32> to vector<8x64xf32>
    %141 = arith.mulf %140, %138 : vector<8x64xf32>
    %142 = vector.extract_strided_slice %126 {offsets = [2, 0, 0], sizes = [1, 8, 64], strides = [1, 1, 1]} : vector<8x8x64xf32> to vector<1x8x64xf32>
    %143 = vector.shape_cast %142 : vector<1x8x64xf32> to vector<8x64xf32>
    %144 = arith.addf %141, %143 : vector<8x64xf32>
    %145 = vector.extract_strided_slice %121 {offsets = [3, 0, 0], sizes = [1, 8, 64], strides = [1, 1, 1]} : vector<8x8x64xf32> to vector<1x8x64xf32>
    %146 = vector.shape_cast %145 : vector<1x8x64xf32> to vector<8x64xf32>
    %147 = arith.mulf %146, %144 : vector<8x64xf32>
    %148 = vector.extract_strided_slice %126 {offsets = [3, 0, 0], sizes = [1, 8, 64], strides = [1, 1, 1]} : vector<8x8x64xf32> to vector<1x8x64xf32>
    %149 = vector.shape_cast %148 : vector<1x8x64xf32> to vector<8x64xf32>
    %150 = arith.addf %147, %149 : vector<8x64xf32>
    %151 = vector.extract_strided_slice %121 {offsets = [4, 0, 0], sizes = [1, 8, 64], strides = [1, 1, 1]} : vector<8x8x64xf32> to vector<1x8x64xf32>
    %152 = vector.shape_cast %151 : vector<1x8x64xf32> to vector<8x64xf32>
    %153 = arith.mulf %152, %150 : vector<8x64xf32>
    %154 = vector.extract_strided_slice %126 {offsets = [4, 0, 0], sizes = [1, 8, 64], strides = [1, 1, 1]} : vector<8x8x64xf32> to vector<1x8x64xf32>
    %155 = vector.shape_cast %154 : vector<1x8x64xf32> to vector<8x64xf32>
    %156 = arith.addf %153, %155 : vector<8x64xf32>
    %157 = vector.extract_strided_slice %121 {offsets = [5, 0, 0], sizes = [1, 8, 64], strides = [1, 1, 1]} : vector<8x8x64xf32> to vector<1x8x64xf32>
    %158 = vector.shape_cast %157 : vector<1x8x64xf32> to vector<8x64xf32>
    %159 = arith.mulf %158, %156 : vector<8x64xf32>
    %160 = vector.extract_strided_slice %126 {offsets = [5, 0, 0], sizes = [1, 8, 64], strides = [1, 1, 1]} : vector<8x8x64xf32> to vector<1x8x64xf32>
    %161 = vector.shape_cast %160 : vector<1x8x64xf32> to vector<8x64xf32>
    %162 = arith.addf %159, %161 : vector<8x64xf32>
    %163 = vector.extract_strided_slice %121 {offsets = [6, 0, 0], sizes = [1, 8, 64], strides = [1, 1, 1]} : vector<8x8x64xf32> to vector<1x8x64xf32>
    %164 = vector.shape_cast %163 : vector<1x8x64xf32> to vector<8x64xf32>
    %165 = arith.mulf %164, %162 : vector<8x64xf32>
    %166 = vector.extract_strided_slice %126 {offsets = [6, 0, 0], sizes = [1, 8, 64], strides = [1, 1, 1]} : vector<8x8x64xf32> to vector<1x8x64xf32>
    %167 = vector.shape_cast %166 : vector<1x8x64xf32> to vector<8x64xf32>
    %168 = arith.addf %165, %167 : vector<8x64xf32>
    %169 = vector.extract_strided_slice %121 {offsets = [7, 0, 0], sizes = [1, 8, 64], strides = [1, 1, 1]} : vector<8x8x64xf32> to vector<1x8x64xf32>
    %170 = vector.shape_cast %169 : vector<1x8x64xf32> to vector<8x64xf32>
    %171 = arith.mulf %170, %168 : vector<8x64xf32>
    %172 = vector.extract_strided_slice %126 {offsets = [7, 0, 0], sizes = [1, 8, 64], strides = [1, 1, 1]} : vector<8x8x64xf32> to vector<1x8x64xf32>
    %173 = vector.shape_cast %172 : vector<1x8x64xf32> to vector<8x64xf32>
    %174 = arith.addf %171, %173 : vector<8x64xf32>
    %175 = vector.shape_cast %132 : vector<8x64xf32> to vector<1x8x64xf32>
    %176 = vector.shape_cast %138 : vector<8x64xf32> to vector<1x8x64xf32>
    %177 = vector.shape_cast %144 : vector<8x64xf32> to vector<1x8x64xf32>
    %178 = vector.shape_cast %150 : vector<8x64xf32> to vector<1x8x64xf32>
    %179 = vector.shape_cast %156 : vector<8x64xf32> to vector<1x8x64xf32>
    %180 = vector.shape_cast %162 : vector<8x64xf32> to vector<1x8x64xf32>
    %181 = vector.shape_cast %168 : vector<8x64xf32> to vector<1x8x64xf32>
    %182 = vector.shape_cast %174 : vector<8x64xf32> to vector<1x8x64xf32>
    %183 = tpu.concatenate %175, %176, %177, %178, %179, %180, %181, %182 in 0 : vector<1x8x64xf32>, vector<1x8x64xf32>, vector<1x8x64xf32>, vector<1x8x64xf32>, vector<1x8x64xf32>, vector<1x8x64xf32>, vector<1x8x64xf32>, vector<1x8x64xf32> -> vector<8x8x64xf32>
    %184 = vector.shape_cast %115 : vector<8x8xf32> to vector<8x8x1xf32>
    %185 = vector.broadcast %184 : vector<8x8x1xf32> to vector<8x8x64xf32>
    %186 = arith.mulf %183, %185 : vector<8x8x64xf32>
    %cst_67 = arith.constant dense<0.000000e+00> : vector<8x64xf32>
    %187 = vector.multi_reduction <add>, %186, %cst_67 [1] : vector<8x8x64xf32> to vector<8x64xf32>
    %188 = arith.index_cast %107 : i32 to index
    %c0_68 = arith.constant 0 : index
    %189 = vector.load %arg21[%188, %c0_68] : memref<8x64xf32, #tpu.memory_space<vmem>>, vector<8x64xf32>
    %190 = arith.addf %189, %187 : vector<8x64xf32>
    %191 = arith.index_cast %107 : i32 to index
    %c0_69 = arith.constant 0 : index
    %192 = vector.load %arg21[%191, %c0_69] : memref<8x64xf32, #tpu.memory_space<vmem>>, vector<8x64xf32>
    tpu.vector_store %arg21[%191, %c0_69], %190 {strides = array<i32>} : memref<8x64xf32, #tpu.memory_space<vmem>>, vector<8x64xf32>,
    %c1_i32 = arith.constant 1 : i32
    %c0_70 = arith.constant 0 : index
    %c0_71 = arith.constant 0 : index
    %193 = vector.load %arg21[%c0_70, %c0_71] : memref<8x64xf32, #tpu.memory_space<vmem>>, vector<8x64xf32>
    %cst_72 = arith.constant 0.000000e+00 : f32
    %194 = vector.broadcast %cst_72 : f32 to vector<8x64xf32>
    %195 = arith.subf %194, %36 : vector<8x64xf32>
    %196 = math.exp %195 : vector<8x64xf32>
    %cst_73 = arith.constant 1.000000e+00 : f32
    %197 = vector.broadcast %cst_73 : f32 to vector<8x64xf32>
    %198 = arith.addf %197, %196 : vector<8x64xf32>
    %cst_74 = arith.constant 1.000000e+00 : f32
    %199 = vector.broadcast %cst_74 : f32 to vector<8x64xf32>
    %200 = arith.divf %199, %198 : vector<8x64xf32>
    %201 = arith.mulf %36, %200 : vector<8x64xf32>
    %202 = arith.mulf %193, %201 : vector<8x64xf32>
    %203 = arith.truncf %202 : vector<8x64xf32> to vector<8x64xbf16>
    %c0_75 = arith.constant 0 : index
    %c0_76 = arith.constant 0 : index
    %204 = vector.load %arg13[%c0_75, %c0_76] : memref<64x32xbf16, #tpu.memory_space<vmem>>, vector<64x32xbf16>
    %cst_77 = arith.constant dense<0.000000e+00> : vector<8x32xf32>
    %205 = tpu.matmul %203, %204, %cst_77 {dimension_numbers = #tpu.dot_dimension_numbers<[1], [0], [0], [1], [0, 0, 1, 1], [], []>} : vector<8x64xbf16>, vector<64x32xbf16>, vector<8x32xf32> -> vector<8x32xf32>
    %c0_78 = arith.constant 0 : index
    %c0_79 = arith.constant 0 : index
    %c0_80 = arith.constant 0 : index
    %206 = vector.load %arg14[%c0_78, %c0_79, %c0_80] : memref<1x8x32xf32, #tpu.memory_space<vmem>>, vector<1x8x32xf32>
    %207 = vector.shape_cast %206 : vector<1x8x32xf32> to vector<8x32xf32>
    %208 = vector.shape_cast %205 : vector<8x32xf32> to vector<1x8x32xf32>
    tpu.vector_store %arg14[%c0_78, %c0_79, %c0_80], %208 {strides = array<i32>} : memref<1x8x32xf32, #tpu.memory_space<vmem>>, vector<1x8x32xf32>,
    return
  }
  func.func @transform_0(%arg0: i32) -> (i32, i32, i32) {
    %c0_i32 = arith.constant 0 : i32
    %c0_i32_0 = arith.constant 0 : i32
    %c0_i32_1 = arith.constant 0 : i32
    return %arg0, %c0_i32, %c0_i32_0 : i32, i32, i32
  }
  func.func @transform_1(%arg0: i32) -> (i32, i32, i32) {
    %c0_i32 = arith.constant 0 : i32
    %c0_i32_0 = arith.constant 0 : i32
    %c0_i32_1 = arith.constant 0 : i32
    return %arg0, %c0_i32, %c0_i32_0 : i32, i32, i32
  }
  func.func @transform_2(%arg0: i32) -> (i32, i32) {
    %c0_i32 = arith.constant 0 : i32
    %c0_i32_0 = arith.constant 0 : i32
    %c0_i32_1 = arith.constant 0 : i32
    return %c0_i32, %c0_i32_0 : i32, i32
  }
  func.func @transform_3(%arg0: i32) -> (i32, i32) {
    %c0_i32 = arith.constant 0 : i32
    %c0_i32_0 = arith.constant 0 : i32
    %c0_i32_1 = arith.constant 0 : i32
    return %c0_i32, %c0_i32_0 : i32, i32
  }
  func.func @transform_4(%arg0: i32) -> (i32, i32) {
    %c0_i32 = arith.constant 0 : i32
    %c0_i32_0 = arith.constant 0 : i32
    %c0_i32_1 = arith.constant 0 : i32
    return %c0_i32, %c0_i32_0 : i32, i32
  }
  func.func @transform_5(%arg0: i32) -> (i32, i32) {
    %c0_i32 = arith.constant 0 : i32
    %c0_i32_0 = arith.constant 0 : i32
    %c0_i32_1 = arith.constant 0 : i32
    return %c0_i32, %c0_i32_0 : i32, i32
  }
  func.func @transform_6(%arg0: i32) -> (i32, i32) {
    %c0_i32 = arith.constant 0 : i32
    %c0_i32_0 = arith.constant 0 : i32
    %c0_i32_1 = arith.constant 0 : i32
    return %c0_i32, %c0_i32_0 : i32, i32
  }
  func.func @transform_7(%arg0: i32) -> (i32, i32) {
    %c0_i32 = arith.constant 0 : i32
    %c0_i32_0 = arith.constant 0 : i32
    %c0_i32_1 = arith.constant 0 : i32
    return %c0_i32, %c0_i32_0 : i32, i32
  }
  func.func @transform_8(%arg0: i32) -> (i32, i32) {
    %c0_i32 = arith.constant 0 : i32
    %c0_i32_0 = arith.constant 0 : i32
    %c0_i32_1 = arith.constant 0 : i32
    return %c0_i32, %c0_i32_0 : i32, i32
  }
  func.func @transform_9(%arg0: i32) -> (i32, i32) {
    %c0_i32 = arith.constant 0 : i32
    %c0_i32_0 = arith.constant 0 : i32
    %c0_i32_1 = arith.constant 0 : i32
    return %c0_i32, %c0_i32_0 : i32, i32
  }
  func.func @transform_10(%arg0: i32) -> (i32, i32) {
    %c0_i32 = arith.constant 0 : i32
    %c0_i32_0 = arith.constant 0 : i32
    %c0_i32_1 = arith.constant 0 : i32
    return %c0_i32, %c0_i32_0 : i32, i32
  }
  func.func @transform_11(%arg0: i32) -> (i32, i32) {
    %c0_i32 = arith.constant 0 : i32
    %c0_i32_0 = arith.constant 0 : i32
    %c0_i32_1 = arith.constant 0 : i32
    return %c0_i32, %c0_i32_0 : i32, i32
  }
  func.func @transform_12(%arg0: i32) -> (i32, i32) {
    %c0_i32 = arith.constant 0 : i32
    %c0_i32_0 = arith.constant 0 : i32
    %c0_i32_1 = arith.constant 0 : i32
    return %c0_i32, %c0_i32_0 : i32, i32
  }
  func.func @transform_13(%arg0: i32) -> (i32, i32, i32) {
    %c0_i32 = arith.constant 0 : i32
    %c0_i32_0 = arith.constant 0 : i32
    %c0_i32_1 = arith.constant 0 : i32
    return %arg0, %c0_i32, %c0_i32_0 : i32, i32, i32
  }
  func.func @transform_14(%arg0: i32) -> (i32, i32, i32) {
    %c0_i32 = arith.constant 0 : i32
    %c0_i32_0 = arith.constant 0 : i32
    %c0_i32_1 = arith.constant 0 : i32
    return %arg0, %c0_i32, %c0_i32_0 : i32, i32, i32
  }
}

</mosaic_0001>

<bundles_post_ra>
// kernel: tpu_custom_call.1
= control target key start
LH: loop header
LB: loop body
LE: loop exit
PB: predicated region body
PF: predicated region fallthrough
CT: control target
= control target key end

     0   :  { %s2180_s0 = inlined_call_operand.vmem [shape: f32[2,8,32], index: 0, kind: input, shape index: {}]   ;;  %s2181_s1 = inlined_call_operand.vmem [shape: f32[2,8,32], index: 1, kind: input, shape index: {}]   ;;  %s2182_s2 = inlined_call_operand.vmem [shape: f32[1,32], index: 2, kind: input, shape index: {}]   ;;  %s2183_s3 = inlined_call_operand.vmem [shape: f32[1,32], index: 3, kind: input, shape index: {}]   ;;  %s2184_s4 = inlined_call_operand.vmem [shape: bf16[32,128], index: 4, kind: input, shape index: {}]   ;;  %s2185_s5 = inlined_call_operand.vmem [shape: f32[4,64], index: 5, kind: input, shape index: {}]   ;;  %s2186_s6 = inlined_call_operand.vmem [shape: f32[1,64], index: 6, kind: input, shape index: {}]   ;;  %s2187_s7 = inlined_call_operand.vmem [shape: bf16[64,20], index: 7, kind: input, shape index: {}]   ;;  %s2188_s8 = inlined_call_operand.vmem [shape: f32[4,64], index: 8, kind: input, shape index: {}]   ;;  %s2189_s9 = inlined_call_operand.vmem [shape: f32[1,64], index: 9, kind: input, shape index: {}]   ;;  %s2190_s10 = inlined_call_operand.vmem [shape: f32[8,64], index: 10, kind: input, shape index: {}]   ;;  %s2191_s11 = inlined_call_operand.vmem [shape: f32[1,64], index: 11, kind: input, shape index: {}]   ;;  %s2192_s12 = inlined_call_operand.vmem [shape: bf16[64,32], index: 12, kind: input, shape index: {}]   ;;  %s2193_s13 = inlined_call_operand.hbm [shape: f32[2,8,32], index: 13, kind: output, shape index: {0}]   ;;  %s2194_s14 = inlined_call_operand.hbm [shape: f32[2,8,32], index: 14, kind: output, shape index: {1}]  }
   0x1   :  { %2197 = sst [smem:[#allocation15_spill]] %s2180_s0 }
   0x2   :  { %2198 = sst [smem:[#allocation16_spill]] %s2181_s1 }
   0x3   :  { %2199 = sst [smem:[#allocation17_spill]] %s2182_s2 }
   0x4   :  { %2200 = sst [smem:[#allocation18_spill]] %s2183_s3 }
   0x5   :  { %2201 = sst [smem:[#allocation19_spill]] %s2184_s4 }
   0x6   :  { %2202 = sst [smem:[#allocation20_spill]] %s2185_s5 }
   0x7   :  { %20 = vsyncpa [#allocation9], 0 }
   0x8   :  { %22 = vsyncpa [#allocation9 + $0x1], 0 }
   0x9   :  { %23 = vsyncpa [#allocation11], 0 }
   0xa   :  { %25 = vsyncpa [#allocation11 + $0x1], 0  ;;  %s1851_s29 = smov 0   ;;  %s1853_s30 = smov 0  }
   0xb   :  { %s1855_s15 = smov 0   ;;  %s1857_s16 = smov 0  }
   0xc LB: > { %s1872_s17 = sadd.s32 4294967295, %s1766_s16   ;;  %s1496_s18 = sadd.s32 4294967294, %s1766_s16   ;;  %s1766_s16 = sphi %s1857_s16, %s2218_s16   ;;  %s1762_s15 = sphi %s1855_s15, %s2217_s15   ;;  %s1758_s30 = sphi %s1853_s30, %s2216_s30   ;;  %s1754_s29 = sphi %s1851_s29, %s2215_s29  }
   0xd   : > { %s1876_s19 = sadd.s32 1, %s1766_s16   ;;  %s321_s20 = sadd.s32 1, %s1762_s15 }
   0xe   : > { %s318_s21 = ssub.s32 %s1766_s16, %s1876_s19  ;;  %p331_p0 = scmp.ne.s32.totalorder %s1762_s15, %s1758_s30 }
   0xf   : > { %p319_p1 = scmp.eq.s32.totalorder %s318_s21, 0  ;;  %p332_p2 = scmp.eq.s32.totalorder %s1872_s17, 1 }
  0x10   : > { %p337_p3 = scmp.ne.s32.totalorder %s1758_s30, %s1754_s29  ;;  %p338_p4 = scmp.eq.s32.totalorder %s1496_s18, 1 }
  0x11   : > { %s1887_s22 = scalar_select %p319_p1, %s1762_s15, %s321_s20  }
  0x12   : > { %p1889_p5 = por %p332_p2, %p331_p0  ;;  %p1893_p6 = por %p338_p4, %p337_p3 }
  0x13   : > { %2203 = sst [smem:[#allocation14_spill]] %s1887_s22  ;;  %p1499_p7 = scmp.ge.s32.totalorder %s1766_s16, 1 }
  0x14   : > { %p429_p8 = scmp.lt.s32.totalorder %s1766_s16, 3 }
  0x16   : > { %p430_p9 = pnand %p1499_p7, %p429_p8 }
  0x17   : > { %p483_p10 = scmp.lt.s32.totalorder (!%p430_p9), %s1872_s17, 1  ;;  %s2206_s0 = sld [smem:[#allocation15_spill]] (!%p430_p9) }
  0x18   : > { %433 = sbr.rel (%p430_p9) target bundleno = 1329 (0x531), region = 72  ;;  %s2207_s1 = sld [smem:[#allocation16_spill]] (!%p430_p9) }
  0x19   : > { %s2208_s4 = sld [smem:[#allocation19_spill]] (!%p430_p9)  ;;  %s1771_s27 = smov (!%p430_p9), 116  }
  0x1a   : > { %s2209_s2 = sld [smem:[#allocation17_spill]] (!%p430_p9)  ;;  %s2104_s21 = sand.u32 (!%p430_p9), 1, %s1758_s30  }
  0x1b   : > { %s2210_s3 = sld [smem:[#allocation18_spill]] (!%p430_p9) }
  0x1c   : > { %s2211_s5 = sld [smem:[#allocation20_spill]] (!%p430_p9) }
  0x1d   : > { %s484_s25 = scalar_select %p483_p10, %s1872_s17, 1  ;;  %vm495_vm0 = vcmask 261120   ;;  %v1768_v10 = vmov 0.0   ;;  %vm1769_vm1 = vmmov 0   ;;  %vm587_vm2 = vcmask 518144   ;;  %v1634_v22 = vld [vmem:[%s2187_s7 + $0x18] sm:$0xff]  }
  0x1e   : > { %1545 = vmatprep.subr.bf16.mxu1 %v1768_v10  ;;  %1549 = vmatprep.mubr.msk.bf16.mxu1 %vm1769_vm1, %v1768_v10  ;;  %588 = vst.msk [vmem:[#allocation2] sm:$0x7] %vm587_vm2, %v1768_v10  ;;  %v1635_v23 = vld [vmem:[%s2187_s7 + $0x10] sm:$0xff]   ;;  %v1636_v24 = vld [vmem:[%s2187_s7 + $0x8] sm:$0xff]   ;;  %v1637_v25 = vld [vmem:[%s2187_s7] sm:$0xff]   ;;  %v593_v26 = vlaneseq  ;;  %vm589_vm3 = vcmask 523264  }
  0x1f   : > { %s1502_s26 = sshll.u32 %s484_s25, 3  ;;  %v1632_v9 = vld [vmem:[%s2208_s4 + $0x8] sm:$0xff]   ;;  %v1633_v11 = vld [vmem:[%s2208_s4] sm:$0xff]   ;;  %1565 = vmatprep.subr.mxu0 %v1768_v10  ;;  %1567 = vmatprep.mubr.msk.f32.mxu0 %vm1769_vm1, %v1768_v10  ;;  %vm723_vm4 = vcmask 1043456   ;;  %vm719_vm5 = vcmask 31744   ;;  %s1770_s25 = smov 124  }
  0x20   : > { %s486_s18 = scalar_lea.vmem %s2206_s0, %s1502_s26  ;;  %s490_s22 = scalar_lea.vmem %s2207_s1, %s1502_s26  ;;  %1546 = vmatpush3.bf16.msra.mxu1 %v1632_v9  ;;  %v1504_v16 = vld [vmem:[%s2209_s2] ss:$0 sm:$0xff]  ;;  %v1952_v27 = vshrl.u32 %v593_v26, 7  ;;  %vm822_vm6 = vcmask 64512   ;;  %vm1254_vm8 = vcmask 1041409   ;;  %vm1256_vm9 = vcmask 1042434  }
  0x21   : > { %v492_v0 = vld [vmem:[%s486_s18] sm:$0xff]  ;;  %1547 = vmatprep.subr.bf16.mxu1 %v1768_v10  ;;  %vm1258_vm10 = vcmask 1043459   ;;  %vm1260_vm11 = vcmask 1044484   ;;  %vm1262_vm12 = vcmask 1045509   ;;  %vm1264_vm13 = vcmask 1046534   ;;  %s1367_s0 = scalar_lea.sflag [#allocation11], %s2104_s21 }
  0x22   : > { %v493_v1 = vld [vmem:[%s490_s22] sm:$0xff]  ;;  %v1959_v29 = vsub.s32 0, %v1952_v27  ;;  %v1962_v30 = vsub.s32 1, %v1952_v27  ;;  %v1968_v33 = vsub.s32 2, %v1952_v27  ;;  %v1973_v37 = vsub.s32 3, %v1952_v27  ;;  %s1772_s22 = smov 64  }
  0x23   : > { %v1907_v2 = vadd.f32 %v493_v1, %v492_v0  ;;  %v1505_v18 = vld [vmem:[%s2210_s3] ss:$0 sm:$0xff]  ;;  %v1006_v26 = vsub.s32 7, %v1952_v27  ;;  %vm1266_vm14 = vcmask 1047559   ;;  %s1774_s2 = smov [#allocation10]  }
  0x24   : > { %1548 = vmatpush3.bf16.msra.mxu1 %v1633_v11  ;;  %v591_v32 = vld [vmem:[%s2211_s5] sm:$0xf]  ;;  %s1680_s3 = sshll.u32 %s1774_s2, 4  ;;  %s1681_s3 = int_to_ptr.vmem [resolvable:$false] %s1680_s3 }
  0x25   : > { %v496_v3 = vsel %vm495_vm0, %v1907_v2, 0.0  ;;  %1553 = vmatprep.subr.bf16.mxu1 %v1768_v10  ;;  %v596_v35 = vrot.slane %v591_v32, %v1959_v29  ;;  %v603_v36 = vrot.slane %v591_v32, %v1962_v30  ;;  %v610_v39 = vrot.slane %v591_v32, %v1968_v33  ;;  %v1509_v51 = vld [vmem:[%s2186_s6] ss:$0 sm:$0xff] }
  0x26   : > { %497 = vadd.xlane.f32.xlu0 %v496_v3  ;;  %v617_v45 = vrot.slane %v591_v32, %v1973_v37  ;;  %v1518_v59 = vld [vmem:[%s2191_s11] ss:$0 sm:$0xff] }
  0x27   : > { %v711_v63 = vld [vmem:[%s2188_s8] sm:$0xf] }
  0x28   : > { %1566 = vmatpush3.msk.msra.mxu0 %vm723_vm4, %v711_v63 }
  0x29   : > { %1570 = vmatprep.subr.bf16.mxu0 %v1768_v10 }
  0xaf   : > { %v498_v4 = vpop.xlane.xlu0 %497 }
  0xb0   : > { %v500_v5 = vmul.f32 0.03125, %v498_v4 }
  0xb2   : > { %v501_v6 = vsub.f32 %v1907_v2, %v500_v5 }
  0xb4   : > { %v502_v7 = vmul.f32 %v501_v6, %v501_v6 }
  0xb6   : > { %v503_v8 = vsel %vm495_vm0, %v502_v7, 0.0 }
  0xb7   : > { %504 = vadd.xlane.f32.xlu0 %v503_v8 }
 0x140   : > { %v505_v12 = vpop.xlane.xlu0 %504 }
 0x141   : > { %v506_v13 = vmul.f32 0.03125, %v505_v12 }
 0x143   : > { %v507_v14 = vadd.f32 1e-05, %v506_v13 }
 0x145   : > { %1644 = vrsqrt.f32 %v507_v14 }
 0x152   : > { %v1645_v15 = vpop.eup %1644 }
 0x153   : > { %v509_v17 = vmul.f32 %v1645_v15, %v501_v6 }
 0x155   : > { %v517_v19 = vmul.f32 %v1504_v16, %v509_v17 }
 0x157   : > { %v525_v20 = vadd.f32 %v1505_v18, %v517_v19  ;;  %v985_v18 = vsub.s32 4, %v1952_v27 }
 0x159   : > { %v527_v21 = vpack.c.bf16 %v525_v20, %v525_v20 }
 0x15b   : > { %1550 = vmatmul.mubr.msk.bf16.vlgmr.msra.gmra.mxu1 %vm495_vm0, %v527_v21  ;;  %v992_v21 = vsub.s32 5, %v1952_v27 }
 0x15c   : > { %1561 = vmatprep.mubr.msk.bf16.mxu1 %vm1769_vm1, %v1768_v10  ;;  %1554 = vmatpush3.bf16.msra.mxu1 %v1634_v22 }
 0x15d   : > { %1555 = vmatprep.subr.bf16.mxu1 %v1768_v10 }
 0x160   : > { %1556 = vmatpush3.bf16.msra.mxu1 %v1635_v23 }
 0x161   : > { %1557 = vmatprep.subr.bf16.mxu1 %v1768_v10 }
 0x164   : > { %1558 = vmatpush3.bf16.msra.mxu1 %v1636_v24  ;;  %v999_v24 = vsub.s32 6, %v1952_v27 }
 0x165   : > { %1559 = vmatprep.subr.bf16.mxu1 %v1768_v10 }
 0x168   : > { %1560 = vmatpush3.bf16.msra.mxu1 %v1637_v25 }
 0x21b   : > { %v1954_v28 = vpop.f32.mrf.mxu1 }
 0x21c   : > { %590 = vst.msk [vmem:[#allocation2 + $0x3] sm:$0xff] %vm589_vm3, %v1954_v28  ;;  %v1272_v7 = vsub.f32 0.0, %v1954_v28 }
 0x21d   : > { %v1551_v31 = vpop.f32.mrf.mxu1 }
 0x21e   : > { %v1273_v9 = vmul.f32 1.442695, %v1272_v7 }
 0x21f   : > { %v584_v34 = vpop.f32.mrf.mxu1 }
 0x221   : > { %v1552_v38 = vpop.f32.mrf.mxu1 }
 0x223   : > { %v592_v40 = vld [vmem:[#allocation2] sm:$0xff] }
 0x224   : > { %v599_v41 = vld [vmem:[#allocation2 + $0x1] sm:$0xff]  ;;  %v597_v43 = vmul.f32 %v596_v35, %v592_v40  ;;  %v1515_v40 = vld [vmem:[%s2189_s9] ss:$0 sm:$0xff] }
 0x225   : > { %v606_v42 = vld [vmem:[#allocation2 + $0x2] sm:$0xff]  ;;  %v604_v44 = vmul.f32 %v603_v36, %v599_v41 }
 0x226   : > { %v613_v46 = vld [vmem:[#allocation2 + $0x3] sm:$0xff]  ;;  %v611_v48 = vmul.f32 %v610_v39, %v606_v42 }
 0x227   : > { %v605_v47 = vadd.f32 %v604_v44, %v597_v43  ;;  %v618_v50 = vmul.f32 %v617_v45, %v613_v46 }
 0x229   : > { %v612_v49 = vadd.f32 %v611_v48, %v605_v47  ;;  %v1642_v47 = vld [vmem:[%s2192_s12 + $0x8] sm:$0xff]   ;;  %v1643_v48 = vld [vmem:[%s2192_s12] sm:$0xff]  }
 0x22b   : > { %v619_v52 = vadd.f32 %v618_v50, %v612_v49 }
 0x22d   : > { %v627_v53 = vadd.f32 %v1509_v51, %v619_v52  ;;  %v812_v52 = vld [vmem:[%s2190_s10] sm:$0xff] }
 0x22f   : > { %v628_v54 = vsub.f32 0.0, %v627_v53 }
 0x231   : > { %v629_v55 = vmul.f32 1.442695, %v628_v54  ;;  %v813_v54 = vmul.f32 1.442695, %v812_v52 }
 0x233   : > { %1646 = vpow2.f32 %v629_v55 }
 0x240   : > { %v1647_v56 = vpop.eup %1646 }
 0x241   : > { %v631_v57 = vadd.f32 1.0, %v1647_v56 }
 0x243   : > { %1648 = vrcp.f32 %v631_v57 }
 0x244   : > { %1650 = vpow2.f32 %v1273_v9 }
 0x250   : > { %v1649_v58 = vpop.eup %1648 }
 0x251   : > { %v1983_v60 = vmul.f32 %v1649_v58, %v627_v53  ;;  %v1651_v25 = vpop.eup %1650 }
 0x252   : > { %v1275_v31 = vadd.f32 1.0, %v1651_v25 }
 0x253   : > { %v635_v61 = vpack.c.bf16 %v1983_v60, %v1983_v60  ;;  %v835_v62 = vmul.f32 %v1518_v59, %v1983_v60 }
 0x254   : > { %1652 = vrcp.f32 %v1275_v31 }
 0x255   : > { %1562 = vmatmul.mubr.msk.bf16.vlgmr.msra.gmra.mxu1 %vm589_vm3, %v635_v61  ;;  %836 = vst.msk [vmem:[#allocation7] sm:$0xff] %vm589_vm3, %v835_v62  ;;  %v1773_v61 = vmov 1966171168  }
 0x261   : > { %v1653_v38 = vpop.eup %1652 }
 0x262   : > { %v1278_v39 = vmul.f32 %v1653_v38, %v1954_v28  ;;  %v1641_v28 = vld [vmem:[%s2192_s12 + $0x10] sm:$0xff]  }
 0x315   : > { %v705_v0 = vpop.f32.mrf.mxu1 }
 0x316   : > { %819 = vrot.lane.b32.xlu1 %v705_v0, %s1770_s25  ;;  %1568 = vmatmul.mubr.msk.f32.vlgmr.msra.gmra.mxu0 %vm719_vm5, %v705_v0  ;;  %s2196_s25 = sshll.u32 %s1872_s17, 7 }
 0x317   : > { %v1563_v1 = vpop.f32.mrf.mxu1  ;;  %1578 = vmatprep.mubr.msk.bf16.mxu0 %vm1769_vm1, %v1768_v10  ;;  %s1391_s18 = scalar_lea.hbm %s2194_s14, %s2196_s25 }
 0x319   : > { %v708_v3 = vpop.f32.mrf.mxu1 }
 0x31a   : > { %824 = vrot.lane.b32.xlu1 %v705_v0, %s1771_s27  ;;  %s2195_s27 = sshll.u32 %s2104_s21, 3 }
 0x31b   : > { %v1564_v4 = vpop.f32.mrf.mxu1 }
 0x388   : > { %v820_v5 = vpop.permute.xlu1 %819 }
 0x389   : > { %823 = vst.msk [vmem:[#allocation5] sm:$0xff] %vm822_vm6, %v820_v5 }
 0x38c   : > { %v825_v6 = vpop.permute.xlu1 %824 }
 0x38d   : > { %827 = vst.msk [vmem:[#allocation6] sm:$0xff] %vm822_vm6, %v825_v6 }
 0x390   : > { %v839_v8 = vld [vmem:[#allocation5] sm:$0xff] }
 0x391   : > { %v965_v11 = vrot.slane %v839_v8, %v1962_v30  ;;  %v958_v12 = vrot.slane %v839_v8, %v1959_v29  ;;  %v972_v14 = vrot.slane %v839_v8, %v1968_v33  ;;  %v979_v16 = vrot.slane %v839_v8, %v1973_v37 }
 0x392   : > { %v986_v19 = vrot.slane %v839_v8, %v985_v18  ;;  %v993_v22 = vrot.slane %v839_v8, %v992_v21  ;;  %v1000_v32 = vrot.slane %v839_v8, %v999_v24  ;;  %v1007_v35 = vrot.slane %v839_v8, %v1006_v26 }
 0x393   : > { %967 = vbcast.lane.b32.xlu1 %v965_v11, 256  ;;  %960 = vbcast.lane.b32.xlu0 %v958_v12, 256 }
 0x394   : > { %v840_v13 = vld [vmem:[#allocation6] sm:$0xff] }
 0x395   : > { %v1128_v15 = vrot.slane %v840_v13, %v1959_v29  ;;  %v1142_v17 = vrot.slane %v840_v13, %v1968_v33  ;;  %v1149_v20 = vrot.slane %v840_v13, %v1973_v37  ;;  %v1163_v23 = vrot.slane %v840_v13, %v992_v21 }
 0x396   : > { %v1177_v33 = vrot.slane %v840_v13, %v1006_v26  ;;  %v1135_v34 = vrot.slane %v840_v13, %v1962_v30  ;;  %v1156_v36 = vrot.slane %v840_v13, %v985_v18  ;;  %v1170_v37 = vrot.slane %v840_v13, %v999_v24  ;;  %v1640_v30 = vld [vmem:[%s2192_s12 + $0x18] sm:$0xff]  }
 0x397   : > { %974 = vbcast.lane.b32.xlu1 %v972_v14, 256  ;;  %1130 = vbcast.lane.b32.xlu0 %v1128_v15, 256 }
 0x398   : > { %1571 = vmatpush3.bf16.msra.mxu0 %v1640_v30 }
 0x399   : > { %1572 = vmatprep.subr.bf16.mxu0 %v1768_v10 }
 0x39b   : > { %981 = vbcast.lane.b32.xlu1 %v979_v16, 256  ;;  %1144 = vbcast.lane.b32.xlu0 %v1142_v17, 256 }
 0x39c   : > { %1573 = vmatpush3.bf16.msra.mxu0 %v1641_v28 }
 0x39d   : > { %1574 = vmatprep.subr.bf16.mxu0 %v1768_v10 }
 0x39f   : > { %988 = vbcast.lane.b32.xlu1 %v986_v19, 256  ;;  %1151 = vbcast.lane.b32.xlu0 %v1149_v20, 256 }
 0x3a0   : > { %1575 = vmatpush3.bf16.msra.mxu0 %v1642_v47 }
 0x3a1   : > { %1576 = vmatprep.subr.bf16.mxu0 %v1768_v10  ;;  %v844_v10 = vunpack.c.l.s4 %v1773_v61 }
 0x3a3   : > { %995 = vbcast.lane.b32.xlu1 %v993_v22, 256  ;;  %1165 = vbcast.lane.b32.xlu0 %v1163_v23, 256  ;;  %v845_v1 = vunpack.c.0.s8 %v844_v10 }
 0x3a4   : > { %1577 = vmatpush3.bf16.msra.mxu0 %v1643_v48 }
 0x3a5   : > { %v2035_v3 = vsub.s32 %v845_v1, %v1952_v27 }
 0x3a7   : > { %1002 = vbcast.lane.b32.xlu1 %v1000_v32, 256  ;;  %1179 = vbcast.lane.b32.xlu0 %v1177_v33, 256 }
 0x3ab   : > { %1137 = vbcast.lane.b32.xlu1 %v1135_v34, 256 }
 0x3af   : > { %1009 = vbcast.lane.b32.xlu1 %v1007_v35, 256 }
 0x3b3   : > { %1158 = vbcast.lane.b32.xlu1 %v1156_v36, 256 }
 0x3b7   : > { %1172 = vbcast.lane.b32.xlu1 %v1170_v37, 256 }
 0x3bb   : > { %1280 = vrot.lane.b32.xlu1 %v1278_v39, %s1772_s22  ;;  %s482_s22 = scalar_lea.vmem [#allocation10], %s2195_s27  ;;  %s1682_s27 = scalar_lea.vmem %s1681_s3, 256 }
 0x3bc   : > { %526 = vst.msk [vmem:[%s482_s22] sm:$0xff] %vm495_vm0, %v1907_v2  ;;  %s1393_s20 = sshll.u32 %s482_s22, 4  ;;  %s1394_s20 = int_to_ptr.vmem [resolvable:$true] %s1393_s20 }
 0x3bd   : > { %s1676_s1 = scalar_lea.vmem %s1394_s20, 128  ;;  %p1683_p0 = scmp.lt.s32.totalorder %s1394_s20, %s1681_s3 }
 0x3be   : > { %p1677_p11 = scmp.ne.s32.totalorder %s1394_s20, %s1676_s1  ;;  %p1684_p1 = scmp.lt.s32.totalorder %s1682_s27, %s1676_s1 }
 0x3c0   : > { %p1678_p12 = pnand %p1677_p11, %p1889_p5  ;;  %p1685_p2 = por %p1684_p1, %p1683_p0 }
 0x3c2   : > { %p1679_p13 = pneg %p1678_p12 }
 0x3c4   : > { %p1686_p3 = pnand %p1685_p2, %p1679_p13 }
 0x3d6   : > { %v793_v41 = vpop.f32.mrf.mxu0 }
 0x3d7   : > { %v794_v42 = vadd.f32 %v1515_v40, %v793_v41 }
 0x3d8   : > { %v1569_v43 = vpop.f32.mrf.mxu0 }
 0x3d9   : > { %v798_v44 = vand.u32 2147483647, %v794_v42  ;;  %v797_v59 = vmax.f32 %v794_v42, 0.0 }
 0x3db   : > { %v799_v45 = vsub.f32 0.0, %v798_v44 }
 0x3dd   : > { %v800_v46 = vmul.f32 1.442695, %v799_v45 }
 0x3df   : > { %1654 = vpow2.f32 %v800_v46 }
 0x3ec   : > { %v1655_v49 = vpop.eup %1654 }
 0x3ed   : > { %v802_v50 = vadd.f32 1.0, %v1655_v49  ;;  %v805_v51 = vmul.f32 -0.5, %v1655_v49  ;;  %v808_v55 = vand.u32 2147483647, %v1655_v49 }
 0x3ef   : > { %1656 = vlog2.f32 %v802_v50  ;;  %v806_v53 = vadd.f32 1.0, %v805_v51  ;;  %vm809_vm7 = vcmp.lt.f32.partialorder %v808_v55, 0.0004427343 }
 0x3f0   : > { %1658 = vpow2.f32 %v813_v54 }
 0x3f1   : > { %v807_v58 = vmul.f32 %v1655_v49, %v806_v53 }
 0x3fc   : > { %v1657_v56 = vpop.eup %1656 }
 0x3fd   : > { %v804_v57 = vmul.f32 0.6931472, %v1657_v56  ;;  %v1659_v6 = vpop.eup %1658 }
 0x3fe   : > { %v2043_v13 = vsub.f32 0.0, %v1659_v6 }
 0x3ff   : > { %v810_v62 = vsel %vm809_vm7, %v807_v58, %v804_v57 }
 0x400   : > { %v811_v63 = vadd.f32 %v810_v62, %v797_v59 }
 0x402   : > { %816 = vst.msk [vmem:[#allocation3] sm:$0xff] %vm589_vm3, %v811_v63  ;;  %v817_v0 = vmul.f32 %v811_v63, %v1983_v60 }
 0x404   : > { %818 = vst.msk [vmem:[#allocation4] sm:$0xff] %vm589_vm3, %v817_v0 }
 0x405   : > { %v2037_v4 = vpop.permute.xlu1 %967  ;;  %v961_v46 = vpop.permute.xlu0 %960 }
 0x409   : > { %v837_v5 = vld [vmem:[#allocation3] sm:$0xff]  ;;  %v2041_v12 = vpop.permute.xlu1 %974  ;;  %v1131_v63 = vpop.permute.xlu0 %1130 }
 0x40a   : > { %v849_v7 = vrot.slane %v837_v5, %v2035_v3  ;;  %v842_v8 = vcombine.high %v837_v5, %v837_v5 }
 0x40b   : > { %v838_v23 = vld [vmem:[#allocation4] sm:$0xff] }
 0x40c   : > { %v857_v9 = vcombine.high %v849_v7, %v849_v7  ;;  %v865_v11 = vrot.slane %v849_v7, %v2035_v3  ;;  %v856_v15 = vrot.slane %v842_v8, %v2035_v3  ;;  %v1019_v33 = vrot.slane %v838_v23, %v2035_v3 }
 0x40d   : > { %v2052_v21 = vpop.permute.xlu1 %981  ;;  %v1012_v52 = vcombine.high %v838_v23, %v838_v23 }
 0x40e   : > { %v879_v60 = vrot.slane %v857_v9, %v2035_v3  ;;  %v887_v14 = vcombine.high %v865_v11, %v865_v11  ;;  %v894_v27 = vrot.slane %v865_v11, %v1959_v29  ;;  %v858_v24 = vcombine.high %v856_v15, %v856_v15 }
 0x40f   : > { %v872_v25 = vrot.slane %v856_v15, %v2035_v3  ;;  %v1035_v39 = vrot.slane %v1019_v33, %v2035_v3  ;;  %v1027_v40 = vcombine.high %v1019_v33, %v1019_v33  ;;  %v1026_v1 = vrot.slane %v1012_v52, %v2035_v3 }
 0x410   : > { %v898_v16 = vrot.slane %v879_v60, %v1959_v29  ;;  %v889_v17 = vcombine.high %v879_v60, %v879_v60  ;;  %v902_v18 = vrot.slane %v887_v14, %v1959_v29  ;;  %v931_v19 = vmul.f32 %v894_v27, %v2043_v13 }
 0x411   : > { %v2058_v34 = vpop.permute.xlu1 %988  ;;  %v910_v35 = vrot.slane %v872_v25, %v1959_v29  ;;  %v886_v36 = vrot.slane %v858_v24, %v2035_v3  ;;  %v888_v42 = vcombine.high %v872_v25, %v872_v25  ;;  %v1064_v45 = vrot.slane %v1035_v39, %v1959_v29 }
 0x412   : > { %v932_v20 = vmul.f32 %v898_v16, %v2043_v13  ;;  %v939_v22 = vmul.f32 1.442695, %v931_v19  ;;  %v933_v26 = vmul.f32 %v902_v18, %v2043_v13  ;;  %v906_v32 = vrot.slane %v889_v17, %v1959_v29  ;;  %v1145_v19 = vpop.permute.xlu0 %1144 }
 0x413   : > { %v935_v41 = vmul.f32 %v910_v35, %v2043_v13  ;;  %v914_v43 = vrot.slane %v886_v36, %v1959_v29  ;;  %v1049_v28 = vrot.slane %v1027_v40, %v2035_v3  ;;  %v918_v49 = vrot.slane %v888_v42, %v1959_v29 }
 0x414   : > { %1660 = vpow2.f32 %v939_v22  ;;  %v941_v31 = vmul.f32 1.442695, %v932_v20  ;;  %v943_v37 = vmul.f32 1.442695, %v933_v26  ;;  %v934_v38 = vmul.f32 %v906_v32, %v2043_v13 }
 0x415   : > { %v2066_v44 = vpop.permute.xlu1 %995  ;;  %v947_v47 = vmul.f32 1.442695, %v935_v41  ;;  %v936_v48 = vmul.f32 %v914_v43, %v2043_v13  ;;  %v890_v50 = vcombine.high %v886_v36, %v886_v36  ;;  %v1101_v53 = vmul.f32 %v1064_v45, %v961_v46 }
 0x416   : > { %1662 = vpow2.f32 %v941_v31  ;;  %v945_v30 = vmul.f32 1.442695, %v934_v38  ;;  %v1068_v55 = vrot.slane %v1049_v28, %v1959_v29  ;;  %v1057_v56 = vcombine.high %v1035_v39, %v1035_v39  ;;  %v1152_v38 = vpop.permute.xlu0 %1151 }
 0x417   : > { %1664 = vpow2.f32 %v943_v37  ;;  %v949_v59 = vmul.f32 1.442695, %v936_v48  ;;  %v937_v61 = vmul.f32 %v918_v49, %v2043_v13  ;;  %v922_v10 = vrot.slane %v890_v50, %v1959_v29 }
 0x418   : > { %1666 = vpow2.f32 %v945_v30  ;;  %v1059_v0 = vcombine.high %v1049_v28, %v1049_v28  ;;  %v1102_v5 = vmul.f32 %v1068_v55, %v2037_v4  ;;  %v1072_v7 = vrot.slane %v1057_v56, %v1959_v29 }
 0x419   : > { %1668 = vpow2.f32 %v947_v47  ;;  %v2073_v57 = vpop.permute.xlu1 %1002  ;;  %v951_v9 = vmul.f32 1.442695, %v937_v61  ;;  %v938_v11 = vmul.f32 %v922_v10, %v2043_v13  ;;  %v1042_v27 = vrot.slane %v1026_v1, %v2035_v3 }
 0x41a   : > { %1670 = vpow2.f32 %v949_v59  ;;  %v1076_v14 = vrot.slane %v1059_v0, %v1959_v29  ;;  %v1103_v16 = vmul.f32 %v1072_v7, %v2041_v12  ;;  %v1028_v18 = vcombine.high %v1026_v1, %v1026_v1 }
 0x41b   : > { %1672 = vpow2.f32 %v951_v9  ;;  %v953_v22 = vmul.f32 1.442695, %v938_v11  ;;  %v1080_v13 = vrot.slane %v1042_v27, %v1959_v29  ;;  %v1058_v30 = vcombine.high %v1042_v27, %v1042_v27 }
 0x41c   : > { %v1104_v24 = vmul.f32 %v1076_v14, %v2052_v21  ;;  %v1056_v32 = vrot.slane %v1028_v18, %v2035_v3 }
 0x41d   : > { %v1138_v15 = vpop.permute.xlu1 %1137  ;;  %1674 = vpow2.f32 %v953_v22  ;;  %v1105_v39 = vmul.f32 %v1080_v13, %v2058_v34  ;;  %v1088_v52 = vrot.slane %v1058_v30, %v1959_v29 }
 0x41e   : > { %v1084_v42 = vrot.slane %v1056_v32, %v1959_v29  ;;  %v1060_v56 = vcombine.high %v1056_v32, %v1056_v32 }
 0x41f   : > { %v1107_v1 = vmul.f32 %v1088_v52, %v2073_v57 }
 0x420   : > { %v1106_v50 = vmul.f32 %v1084_v42, %v2066_v44  ;;  %v1092_v11 = vrot.slane %v1060_v56, %v1959_v29 }
 0x421   : > { %v1661_v51 = vpop.eup %1660  ;;  %v1010_v33 = vpop.permute.xlu1 %1009 }
 0x422   : > { %v1109_v54 = vmul.f32 0.0, %v1661_v51 }
 0x423   : > { %v1663_v62 = vpop.eup %1662 }
 0x424   : > { %v1110_v58 = vadd.f32 %v1109_v54, %v1101_v53  ;;  %v1665_v60 = vpop.eup %1664 }
 0x425   : > { %v1667_v23 = vpop.eup %1666  ;;  %v1159_v49 = vpop.permute.xlu1 %1158 }
 0x426   : > { %v1111_v6 = vmul.f32 %v1663_v62, %v1110_v58  ;;  %v1181_v25 = vmul.f32 %v1131_v63, %v1110_v58  ;;  %v1669_v35 = vpop.eup %1668  ;;  %v1166_v62 = vpop.permute.xlu0 %1165 }
 0x427   : > { %v1671_v46 = vpop.eup %1670 }
 0x428   : > { %v1112_v8 = vadd.f32 %v1111_v6, %v1102_v5  ;;  %v1189_v21 = vsel %vm589_vm3, %v1181_v25, 0.0  ;;  %v1673_v59 = vpop.eup %1672 }
 0x429   : > { %v1190_v47 = vrot.slane %v1189_v21, 4 }
 0x42a   : > { %v1113_v17 = vmul.f32 %v1665_v60, %v1112_v8  ;;  %v1182_v20 = vmul.f32 %v1138_v15, %v1112_v8  ;;  %v1675_v60 = vpop.eup %1674 }
 0x42b   : > { %v1191_v61 = vadd.f32 %v1190_v47, %v1189_v21 }
 0x42c   : > { %v1114_v4 = vadd.f32 %v1113_v17, %v1103_v16  ;;  %v1196_v36 = vsel %vm589_vm3, %v1182_v20, 0.0  ;;  %v1173_v16 = vpop.permute.xlu1 %1172  ;;  %v1108_v17 = vmul.f32 %v1092_v11, %v1010_v33 }
 0x42d   : > { %v1197_v43 = vrot.slane %v1196_v36, 4  ;;  %v1192_v14 = vrot.slane %v1191_v61, 2 }
 0x42e   : > { %v1183_v26 = vmul.f32 %v1145_v19, %v1114_v4  ;;  %v1115_v31 = vmul.f32 %v1667_v23, %v1114_v4 }
 0x42f   : > { %v1198_v53 = vadd.f32 %v1197_v43, %v1196_v36  ;;  %v1193_v13 = vadd.f32 %v1192_v14, %v1191_v61 }
 0x430   : > { %v1116_v12 = vadd.f32 %v1115_v31, %v1104_v24  ;;  %v1203_v37 = vsel %vm589_vm3, %v1183_v26, 0.0  ;;  %v1180_v31 = vpop.permute.xlu0 %1179 }
 0x431   : > { %v1204_v3 = vrot.slane %v1203_v37, 4  ;;  %v1199_v44 = vrot.slane %v1198_v53, 2 }
 0x432   : > { %v1184_v40 = vmul.f32 %v1152_v38, %v1116_v12  ;;  %v1117_v41 = vmul.f32 %v1669_v35, %v1116_v12 }
 0x433   : > { %v1205_v54 = vadd.f32 %v1204_v3, %v1203_v37  ;;  %v1200_v57 = vadd.f32 %v1199_v44, %v1198_v53 }
 0x434   : > { %v1210_v45 = vsel %vm589_vm3, %v1184_v40, 0.0  ;;  %v1118_v28 = vadd.f32 %v1117_v41, %v1105_v39  ;;  %v1194_v39 = vrot.slane %v1193_v13, 1 }
 0x435   : > { %v1211_v48 = vrot.slane %v1210_v45, 4  ;;  %v1206_v7 = vrot.slane %v1205_v54, 2  ;;  %v1201_v36 = vrot.slane %v1200_v57, 1 }
 0x436   : > { %v1119_v51 = vmul.f32 %v1671_v46, %v1118_v28  ;;  %v1185_v34 = vmul.f32 %v1159_v49, %v1118_v28  ;;  %v1195_v46 = vadd.f32 %v1194_v39, %v1193_v13 }
 0x437   : > { %v1212_v10 = vadd.f32 %v1211_v48, %v1210_v45  ;;  %v1207_v22 = vadd.f32 %v1206_v7, %v1205_v54  ;;  %v1202_v43 = vadd.f32 %v1201_v36, %v1200_v57 }
 0x438   : > { %v1120_v55 = vadd.f32 %v1119_v51, %v1106_v50  ;;  %v1217_v58 = vsel %vm589_vm3, %v1185_v34, 0.0 }
 0x439   : > { %v1218_v63 = vrot.slane %v1217_v58, 4  ;;  %v1213_v27 = vrot.slane %v1212_v10, 2  ;;  %v1208_v33 = vrot.slane %v1207_v22, 1  ;;  %v1255_v34 = vsel %vm1254_vm8, %v1202_v43, %v1195_v46 }
 0x43a   : > { %v1186_v0 = vmul.f32 %v1166_v62, %v1120_v55  ;;  %v1121_v5 = vmul.f32 %v1673_v59, %v1120_v55  ;;  %v1245_v62 = vld [vmem:[#allocation7] sm:$0xff] }
 0x43b   : > { %v1219_v6 = vadd.f32 %v1218_v63, %v1217_v58  ;;  %v1214_v25 = vadd.f32 %v1213_v27, %v1212_v10  ;;  %v1209_v28 = vadd.f32 %v1208_v33, %v1207_v22 }
 0x43c   : > { %v1224_v8 = vsel %vm589_vm3, %v1186_v0, 0.0  ;;  %v1122_v9 = vadd.f32 %v1121_v5, %v1107_v1  ;;  %v1281_v1 = vpop.permute.xlu1 %1280 }
 0x43d   : > { %v1225_v15 = vrot.slane %v1224_v8, 4  ;;  %v1220_v19 = vrot.slane %v1219_v6, 2  ;;  %v1215_v21 = vrot.slane %v1214_v25, 1  ;;  %v1257_v53 = vsel %vm1256_vm9, %v1209_v28, %v1255_v34 }
 0x43e   : > { %v1123_v18 = vmul.f32 %v1675_v60, %v1122_v9  ;;  %v1187_v4 = vmul.f32 %v1173_v16, %v1122_v9 }
 0x43f   : > { %v1226_v20 = vadd.f32 %v1225_v15, %v1224_v8  ;;  %v1221_v35 = vadd.f32 %v1220_v19, %v1219_v6  ;;  %v1216_v47 = vadd.f32 %v1215_v21, %v1214_v25 }
 0x440   : > { %v1124_v23 = vadd.f32 %v1123_v18, %v1108_v17  ;;  %v1231_v24 = vsel %vm589_vm3, %v1187_v4, 0.0 }
 0x441   : > { %v1227_v26 = vrot.slane %v1226_v20, 2  ;;  %v1232_v29 = vrot.slane %v1231_v24, 4  ;;  %v1222_v42 = vrot.slane %v1221_v35, 1  ;;  %v1259_v56 = vsel %vm1258_vm10, %v1216_v47, %v1257_v53 }
 0x442   : > { %v1188_v32 = vmul.f32 %v1180_v31, %v1124_v23 }
 0x443   : > { %v1228_v12 = vadd.f32 %v1227_v26, %v1226_v20  ;;  %v1233_v37 = vadd.f32 %v1232_v29, %v1231_v24  ;;  %v1223_v50 = vadd.f32 %v1222_v42, %v1221_v35 }
 0x444   : > { %v1238_v38 = vsel %vm589_vm3, %v1188_v32, 0.0 }
 0x445   : > { %v1239_v40 = vrot.slane %v1238_v38, 4  ;;  %v1234_v41 = vrot.slane %v1233_v37, 2  ;;  %v1229_v30 = vrot.slane %v1228_v12, 1  ;;  %v1261_v58 = vsel %vm1260_vm11, %v1223_v50, %v1259_v56 }
 0x447   : > { %v1240_v3 = vadd.f32 %v1239_v40, %v1238_v38  ;;  %v1235_v45 = vadd.f32 %v1234_v41, %v1233_v37  ;;  %v1230_v51 = vadd.f32 %v1229_v30, %v1228_v12 }
 0x449   : > { %v1241_v48 = vrot.slane %v1240_v3, 2  ;;  %v1236_v49 = vrot.slane %v1235_v45, 1  ;;  %v1263_v61 = vsel %vm1262_vm12, %v1230_v51, %v1261_v58 }
 0x44b   : > { %v1242_v52 = vadd.f32 %v1241_v48, %v1240_v3  ;;  %v1237_v54 = vadd.f32 %v1236_v49, %v1235_v45 }
 0x44d   : > { %v1243_v55 = vrot.slane %v1242_v52, 1  ;;  %v1265_v10 = vsel %vm1264_vm13, %v1237_v54, %v1263_v61 }
 0x44f   : > { %v1244_v59 = vadd.f32 %v1243_v55, %v1242_v52 }
 0x451   : > { %v1267_v63 = vsel %vm1266_vm14, %v1244_v59, %v1265_v10 }
 0x452   : > { %v1269_v0 = vadd.f32 %v1267_v63, %v1245_v62 }
 0x454   : > { %1270 = vst.msk [vmem:[#allocation7] sm:$0xff] %vm589_vm3, %v1269_v0 }
 0x45b   : > { %v1271_v5 = vld [vmem:[#allocation7] sm:$0xff] }
 0x45c   : > { %v1283_v44 = vmul.f32 %v1281_v1, %v1271_v5 }
 0x45e   : > { %v1284_v6 = vpack.c.bf16 %v1283_v44, %v1283_v44 }
 0x460   : > { %1579 = vmatmul.mubr.msk.bf16.vlgmr.msra.gmra.mxu0 %vm589_vm3, %v1284_v6 }
 0x461   : > { %1689 = shalt.err (!%p1686_p3)
}
 0x462   : > { %s1690_s4 = scalar_lea.hbm %s1391_s18, 128  ;;  %s1694_s28 = scalar_lea.hbm %s2194_s14, 256 }
 0x463   : > { %p1691_p4 = scmp.ne.s32.totalorder %s1391_s18, %s1690_s4  ;;  %p1695_p9 = scmp.lt.s32.totalorder %s1391_s18, %s2194_s14 }
 0x464   : > { %p1696_p10 = scmp.lt.s32.totalorder %s1694_s28, %s1690_s4 }
 0x465   : > { %p1692_p7 = pnand %p1691_p4, %p1889_p5 }
 0x466   : > { %p1697_p11 = por %p1696_p10, %p1695_p9 }
 0x467   : > { %p1693_p8 = pneg %p1692_p7 }
 0x469   : > { %p1698_p12 = pnand %p1697_p11, %p1693_p8 }
 0x46b   : > { %1701 = shalt.err (!%p1698_p12)
}
 0x46c   : > { %1583 = dma.vmem_to_hbm [thread:$0]  (%p1889_p5), %s1394_s20, 128, %s1391_s18, %s1367_s0  }
 0x46d   : > { %s2212_s1 = sshll.u32 %s2104_s21, 3  ;;  %s2213_s27 = sshll.u32 %s1872_s17, 7 }
 0x46e   : > { %s475_s2 = scalar_lea.vmem [#allocation8], %s2212_s1  ;;  %s2137_s5 = scalar_lea.hbm %s2193_s13, %s2213_s27 }
 0x46f   : > { %s1380_s3 = sshll.u32 %s475_s2, 4  ;;  %s1362_s4 = scalar_lea.sflag [#allocation9], %s2104_s21  ;;  %s2139_s3 = int_to_ptr.vmem [resolvable:$true] %s1380_s3 }
 0x470   : > { %s1702_s0 = scalar_lea.vmem %s2139_s3, 128  ;;  %s1775_s17 = smov [#allocation8]  }
 0x471   : > { %p1703_p13 = scmp.ne.s32.totalorder %s2139_s3, %s1702_s0  ;;  %s1706_s25 = sshll.u32 %s1775_s17, 4  ;;  %s1707_s25 = int_to_ptr.vmem [resolvable:$false] %s1706_s25 }
 0x472   : > { %s1708_s18 = scalar_lea.vmem %s1707_s25, 256  ;;  %p1709_p2 = scmp.lt.s32.totalorder %s2139_s3, %s1707_s25 }
 0x473   : > { %p1704_p0 = pnand %p1703_p13, %p1889_p5  ;;  %p1710_p3 = scmp.lt.s32.totalorder %s1708_s18, %s1702_s0 }
 0x475   : > { %p1705_p1 = pneg %p1704_p0  ;;  %p1711_p4 = por %p1710_p3, %p1709_p2 }
 0x477   : > { %p1712_p7 = pnand %p1711_p4, %p1705_p1 }
 0x520   : > { %v1354_v2 = vpop.f32.mrf.mxu0 }
 0x521   : > { %1360 = vst.msk [vmem:[%s475_s2] sm:$0xff] %vm495_vm0, %v1354_v2 }
 0x522   : > { %v1580_v7 = vpop.f32.mrf.mxu0 }
 0x523   : > { %1715 = shalt.err (!%p1712_p7)
}
 0x524   : > { %s1716_s20 = scalar_lea.hbm %s2137_s5, 128  ;;  %s1720_s1 = scalar_lea.hbm %s2193_s13, 256 }
 0x525   : > { %p1717_p8 = scmp.ne.s32.totalorder %s2137_s5, %s1716_s20  ;;  %p1721_p11 = scmp.lt.s32.totalorder %s2137_s5, %s2193_s13 }
 0x526   : > { %p1722_p12 = scmp.lt.s32.totalorder %s1720_s1, %s1716_s20 }
 0x527   : > { %p1718_p9 = pnand %p1717_p8, %p1889_p5 }
 0x528   : > { %p1723_p13 = por %p1722_p12, %p1721_p11 }
 0x529   : > { %p1719_p10 = pneg %p1718_p9 }
 0x52b   : > { %p1724_p0 = pnand %p1723_p13, %p1719_p10 }
 0x52d   : > { %1727 = shalt.err (!%p1724_p0)
}
 0x52e   : > { %1582 = dma.vmem_to_hbm [thread:$0]  (%p1889_p5), %s2139_s3, 128, %s2137_s5, %s1362_s4   ;;  %v1357_v8 = vpop.f32.mrf.mxu0 }
 0x530   : > { %v1581_v9 = vpop.f32.mrf.mxu0 }
 0x531 PF: > { %p1593_p1 = scmp.ge.s32.totalorder %s1766_s16, 2  ;;  %s1405_s22 = sand.u32 1, %s1754_s29  }
 0x532   : > { %s1406_s26 = scalar_lea.sflag [#allocation9], %s1405_s22 }
 0x533   : > { %p1587_p2 = pnand %p1593_p1, %p1893_p6 }
 0x535   : > { %p1588_p3 = pneg %p1587_p2 }
 0x537   : > { %1745 = dma.done.wait (%p1588_p3), %s1406_s26, 128  }
 0x538   : > { %1747 = vsyncadd (%p1588_p3), %s1406_s26, 4294967168  ;;  %s1415_s0 = scalar_lea.sflag [#allocation11], %s1405_s22 }
 0x539   : > { %1749 = dma.done.wait (%p1588_p3), %s1415_s0, 128  }
 0x53a   : > { %1751 = vsyncadd (%p1588_p3), %s1415_s0, 4294967168  ;;  %s2214_s23 = sld [smem:[#allocation14_spill]]  ;;  %p28_p5 = scmp.ge.s32.totalorder %s1876_s19, 4  }
 0x53b   : > { %s2215_s29 = smov %s1758_s30  ;;  %s2216_s30 = smov %s1762_s15 }
 0x53c   : > { %s2218_s16 = smov %s1876_s19  ;;  %30 = sbr.rel (!%p28_p5) target bundleno = 12 (0xc), region = 127 }
 0x540   : > { %s2217_s15 = smov %s2214_s23 }
 0x541   :  { %1420 = vsyncpa [#allocation9], 1 }
 0x542   :  { %1422 = vsyncpa [#allocation9 + $0x1], 1 }
 0x543   :  { %1423 = vsyncpa [#allocation11], 1 }
 0x544   :  { %1425 = vsyncpa [#allocation11 + $0x1], 1 }

</bundles_post_ra>
